<compile_context>
chip_gen: v5e
topology: v5e:2x2
jax: 0.10.0
libtpu: 0.0.40
codegen_flags: <defaults>
</compile_context>

<pallas_src>
import functools

import jax
import jax.numpy as jnp
from jax.experimental import pallas as pl
from jax.experimental.pallas import tpu as pltpu


# --------------------------------------------------------------------------- #
# Kernel
# --------------------------------------------------------------------------- #
def _lbad_kernel(x_ref, w_ref, b_ref, o_ref, acc_ref):
    """One (tm, tn) output tile of relu(x @ W + b), accumulated over K.

    x_ref:   (tm, tk)  activation tile
    w_ref:   (tk, tn)  weight tile already in (in_features, out_features)
                       layout -> canonical MXU matmul, no in-kernel transpose
    b_ref:   (1,  tn)  bias row (f32)
    o_ref:   (tm, tn)  output tile
    acc_ref: (tm, tn)  f32 accumulator scratch (persists across the K axis)
    """
    k = pl.program_id(2)

    @pl.when(k == 0)
    def _init():
        # Fold the bias into the accumulator init: removes a full (tm, tn)
        # VPU add from the finalize (which sits on the critical path right
        # before the output store).
        acc_ref[...] = jnp.broadcast_to(b_ref[...], acc_ref.shape)

    acc_ref[...] += jnp.dot(
        x_ref[...], w_ref[...], preferred_element_type=jnp.float32
    )

    @pl.when(k == pl.num_programs(2) - 1)
    def _finalize():
        o_ref[...] = jnp.maximum(acc_ref[...], 0.0).astype(o_ref.dtype)

    # TODO(synk): BatchNorm1d (use_bn=True), weight-norm (use_wn=True) and
    # train-mode Dropout are not implemented; the default LBAD config makes
    # them identity / absent at inference.  Train-mode dropout would generate
    # its mask in-kernel with pltpu.prng_seed + pltpu.prng_random_bits.


# --------------------------------------------------------------------------- #
# Tiling helpers
# --------------------------------------------------------------------------- #
def _round_up(v: int, m: int) -> int:
    return ((v + m - 1) // m) * m


def _pick_tile(dim: int, align: int, cap: int) -> int:
    """Tile for a K/N dim: aligned to `align`, <= cap, preferring an exact
    divisor of the aligned dim so no jnp.pad copy is triggered."""
    padded = _round_up(dim, align)
    if padded <= cap:
        return padded                           # single block; pad only to `align`
    cap_tile = cap - (cap % align)
    best = align
    t = cap_tile
    while t >= align:
        if padded % t == 0:
            best = t
            break
        t -= align
    # Fall back to a cap-sized (padding) tile only when the best exact divisor
    # is tiny AND cap-padding is cheap (< 1/8 extra along this dim).
    if best * 4 < cap_tile and (_round_up(dim, cap_tile) - dim) * 8 <= dim:
        return cap_tile
    return best


def _pick_m_tile(n: int, sub: int, cap: int) -> int:
    """Tile for the M (batch) dim: prefers padding the ragged M edge of x over
    a tiny tm, because small tm multiplies weight re-reads (the dominant HBM
    stream for typical inference shapes)."""
    padded = _round_up(n, sub)
    if padded <= cap:
        return padded
    cap_tile = cap - (cap % sub)
    t = cap_tile
    while t >= cap_tile // 2:
        if padded % t == 0:
            return t
        t -= sub
    return cap_tile


def _vmem_limits():
    """Returns (tile_budget_bytes, vmem_limit_bytes) from the chip's VMEM."""
    phys = None
    try:
        phys = getattr(pltpu.get_tpu_info(), "vmem_capacity_bytes", None)
    except Exception:
        phys = None
    if not phys:
        phys = 64 << 20            # conservative default: v7x per-TC VMEM
    # Scoped limit: stay well under physical (v7x: 48 MiB of 64; v5e/v6e:
    # <= 100 MiB of 128).  Tile budget leaves room for Mosaic internal scratch.
    vmem_limit = min((phys * 3) // 4, 100 << 20)
    tile_budget = (vmem_limit * 4) // 5
    return tile_budget, vmem_limit


def _choose_tiles(n, f_in, f_out, dtype, vmem_budget):
    itemsize = jnp.dtype(dtype).itemsize
    sub = 8 if itemsize >= 4 else 16
    tk_cap = 2048 if itemsize >= 4 else 4096

    tm = _pick_m_tile(n, sub, 512)
    tn = _pick_tile(f_out, 128, 512)
    tk = _pick_tile(f_in, 128, tk_cap)

    def footprint(tm_, tn_, tk_):
        return (2 * (tm_ * tk_ + tk_ * tn_) * itemsize   # double-buffered x, W
                + 2 * tm_ * tn_ * itemsize               # double-buffered out
                + tm_ * tn_ * 4                          # f32 accumulator
                + 2 * tn_ * 4)                           # bias

    x_bytes = n * f_in * itemsize
    w_bytes = f_in * f_out * itemsize

    # Shrink K first (pipeline granularity only, no extra HBM re-reads) ...
    while footprint(tm, tn, tk) > vmem_budget and tk > 512:
        tk = max(128, _round_up(tk // 2, 128))
    # ... then the tile edge on the smaller operand's side, so the dominant
    # HBM stream keeps few re-reads (weight re-reads scale with M/tm,
    # activation re-reads with N/tn).
    while footprint(tm, tn, tk) > vmem_budget and (tm > sub or tn > 128):
        if tn > 128 and (w_bytes >= x_bytes or tm <= sub):
            tn = max(128, _round_up(tn // 2, 128))
        else:
            tm = max(sub, _round_up(tm // 2, sub))

    # v7x megacore: if the natural grid collapses to a single parallel block,
    # split a tile so both TensorCores get work.
    if _round_up(n, tm) == tm and _round_up(f_out, tn) == tn:
        if tn >= 256:
            tn = max(128, (tn // 2) // 128 * 128)
        elif tm >= 2 * sub:
            tm = max(sub, _round_up(tm // 2, sub))

    return tm, tn, tk


# --------------------------------------------------------------------------- #
# Wrapper
# --------------------------------------------------------------------------- #
@functools.partial(jax.jit, static_argnames=("force_pallas",))
def lbad_forward(x, weight, bias, force_pallas=False):
    """relu(x @ weight.T + bias); weight in PyTorch (out_features, in_features) layout."""
    n, f_in = x.shape
    f_out = weight.shape[0]

    # Small-shape fallback: pallas_call launch + pad/slice copies dominate at
    # tiny sizes; XLA's fused matmul+bias+relu is faster there.
    if not force_pallas and 2 * n * f_in * f_out < (1 << 22):
        return jnp.maximum(x @ weight.T + bias, 0.0)

    tile_budget, vmem_limit = _vmem_limits()
    tm, tn, tk = _choose_tiles(n, f_in, f_out, x.dtype, tile_budget)

    m_p = _round_up(n, tm)
    k_p = _round_up(f_in, tk)
    o_p = _round_up(f_out, tn)

    # One-time transpose of the (frozen, inference) weight to
    # (in_features, out_features): the in-kernel dot is then the canonical
    # (tm, tk) x (tk, tn) MXU matmul with no per-K-step transpose.
    w_t = weight.T

    x_p = x if (m_p, k_p) == (n, f_in) else jnp.pad(
        x, ((0, m_p - n), (0, k_p - f_in)))
    w_p = w_t if (k_p, o_p) == (f_in, f_out) else jnp.pad(
        w_t, ((0, k_p - f_in), (0, o_p - f_out)))
    b_p = bias.astype(jnp.float32)
    if o_p != f_out:
        b_p = jnp.pad(b_p, (0, o_p - f_out))
    b_p = b_p.reshape(1, o_p)

    grid = (m_p // tm, o_p // tn, k_p // tk)
    gi, gj, _ = grid
    itemsize = jnp.dtype(x.dtype).itemsize

    # Real re-streaming: x is read once per N-block, W once per M-block.
    bytes_accessed = (m_p * k_p * itemsize * gj
                      + k_p * o_p * itemsize * gi
                      + o_p * 4 * gi
                      + m_p * o_p * itemsize)
    flops = 2 * m_p * k_p * o_p

    out_p = pl.pallas_call(
        _lbad_kernel,
        out_shape=jax.ShapeDtypeStruct((m_p, o_p), x.dtype),
        grid_spec=pltpu.PrefetchScalarGridSpec(
            num_scalar_prefetch=0,
            grid=grid,
            in_specs=[
                pl.BlockSpec((tm, tk), lambda i, j, k: (i, k)),   # x
                pl.BlockSpec((tk, tn), lambda i, j, k: (k, j)),   # W.T (in, out)
                pl.BlockSpec((1, tn), lambda i, j, k: (0, j)),    # bias
            ],
            out_specs=pl.BlockSpec((tm, tn), lambda i, j, k: (i, j)),
            scratch_shapes=[pltpu.VMEM((tm, tn), jnp.float32)],
        ),
        compiler_params=pltpu.CompilerParams(
            dimension_semantics=("parallel", "parallel", "arbitrary"),
            vmem_limit_bytes=int(vmem_limit),
        ),
        cost_estimate=pl.CostEstimate(
            flops=flops, transcendentals=0, bytes_accessed=bytes_accessed),
    )(x_p, w_p, b_p)

    if (m_p, o_p) == (n, f_out):
        return out_p
    return out_p[:n, :f_out]


# --------------------------------------------------------------------------- #
# Test
# --------------------------------------------------------------------------- #
if __name__ == "__main__":
    key = jax.random.PRNGKey(0)
    kx, kw, kb, kx2, kw2, kb2 = jax.random.split(key, 6)

    # Small shapes consistent with the module: batch=8, in_features=32, out=64.
    N, F_IN, F_OUT = 8, 32, 64
    x = jax.random.normal(kx, (N, F_IN), dtype=jnp.float32)
    bound = 1.0 / (F_IN ** 0.5)   # mimics nn.Linear's uniform init range
    weight = jax.random.uniform(kw, (F_OUT, F_IN), minval=-bound, maxval=bound,
                                dtype=jnp.float32)
    bias = jax.random.uniform(kb, (F_OUT,), minval=-bound, maxval=bound,
                              dtype=jnp.float32)

    ref = jnp.maximum(x @ weight.T + bias, 0.0)

    # Exercise the Pallas kernel even at the small shape ...
    out_pallas = jax.block_until_ready(lbad_forward(x, weight, bias,
                                                    force_pallas=True))
    # ... and the small-shape XLA fallback path.
    out_fallback = jax.block_until_ready(lbad_forward(x, weight, bias))

    assert out_pallas.shape == (N, F_OUT)
    assert jnp.allclose(out_pallas, ref, atol=1e-4, rtol=1e-4)
    assert jnp.allclose(out_fallback, ref, atol=1e-4, rtol=1e-4)

    # A ragged shape exercising the multi-block grid, padding and final slice.
    N2, F_IN2, F_OUT2 = 100, 200, 384
    x2 = jax.random.normal(kx2, (N2, F_IN2), dtype=jnp.float32)
    b2 = 1.0 / (F_IN2 ** 0.5)
    w2 = jax.random.uniform(kw2, (F_OUT2, F_IN2), minval=-b2, maxval=b2,
                            dtype=jnp.float32)
    bias2 = jax.random.uniform(kb2, (F_OUT2,), minval=-b2, maxval=b2,
                               dtype=jnp.float32)
    ref2 = jnp.maximum(x2 @ w2.T + bias2, 0.0)
    out2 = jax.block_until_ready(lbad_forward(x2, w2, bias2))
    assert out2.shape == (N2, F_OUT2)
    assert jnp.allclose(out2, ref2, atol=2e-3, rtol=2e-3)

    print("KERNEL_OK")
</pallas_src>

<mosaic_0001>
module attributes {stable_mosaic.version = 11 : i64} {
  func.func @_lbad_kernel(%arg0: i32, %arg1: i32, %arg2: i32, %arg3: memref<8x128xf32, #tpu.memory_space<vmem>>, %arg4: memref<128x128xf32, #tpu.memory_space<vmem>>, %arg5: memref<1x128xf32, #tpu.memory_space<vmem>>, %arg6: memref<8x128xf32, #tpu.memory_space<vmem>>, %arg7: memref<8x128xf32, #tpu.memory_space<vmem>>) attributes {dimension_semantics = [#tpu.dimension_semantics<parallel>, #tpu.dimension_semantics<parallel>, #tpu.dimension_semantics<arbitrary>], iteration_bounds = array<i64: 1, 1, 1>, scalar_prefetch = 0 : i64, scratch_operands = 1 : i64, tpu.core_type = #tpu.core_type<tc>, window_params = [{transform_indices = @transform_0, window_bounds = array<i64: 8, 128>}, {transform_indices = @transform_1, window_bounds = array<i64: 128, 128>}, {transform_indices = @transform_2, window_bounds = array<i64: 1, 128>}, {transform_indices = @transform_3, window_bounds = array<i64: 8, 128>}]} {
    %c0_i32 = arith.constant 0 : i32
    %0 = arith.cmpi eq, %arg2, %c0_i32 : i32
    %1 = arith.extui %0 : i1 to i32
    %c0_i32_0 = arith.constant 0 : i32
    %2 = arith.cmpi ne, %1, %c0_i32_0 : i32
    scf.if %2 {
      %c0_10 = arith.constant 0 : index
      %c0_11 = arith.constant 0 : index
      %12 = vector.load %arg5[%c0_10, %c0_11] : memref<1x128xf32, #tpu.memory_space<vmem>>, vector<1x128xf32>
      %13 = vector.shape_cast %12 : vector<1x128xf32> to vector<1x128xf32>
      %14 = vector.broadcast %13 : vector<1x128xf32> to vector<8x128xf32>
      %c0_12 = arith.constant 0 : index
      %c0_13 = arith.constant 0 : index
      %15 = vector.load %arg7[%c0_12, %c0_13] : memref<8x128xf32, #tpu.memory_space<vmem>>, vector<8x128xf32>
      tpu.vector_store %arg7[%c0_12, %c0_13], %14 {strides = array<i32>} : memref<8x128xf32, #tpu.memory_space<vmem>>, vector<8x128xf32>,
    } else {
    }
    %c0 = arith.constant 0 : index
    %c0_1 = arith.constant 0 : index
    %3 = vector.load %arg7[%c0, %c0_1] : memref<8x128xf32, #tpu.memory_space<vmem>>, vector<8x128xf32>
    %c0_2 = arith.constant 0 : index
    %c0_3 = arith.constant 0 : index
    %4 = vector.load %arg3[%c0_2, %c0_3] : memref<8x128xf32, #tpu.memory_space<vmem>>, vector<8x128xf32>
    %c0_4 = arith.constant 0 : index
    %c0_5 = arith.constant 0 : index
    %5 = vector.load %arg4[%c0_4, %c0_5] : memref<128x128xf32, #tpu.memory_space<vmem>>, vector<128x128xf32>
    %cst = arith.constant dense<0.000000e+00> : vector<8x128xf32>
    %6 = tpu.matmul %4, %5, %cst {dimension_numbers = #tpu.dot_dimension_numbers<[1], [0], [0], [1], [0, 0, 1, 1], [], []>} : vector<8x128xf32>, vector<128x128xf32>, vector<8x128xf32> -> vector<8x128xf32>
    %7 = arith.addf %3, %6 : vector<8x128xf32>
    %c0_6 = arith.constant 0 : index
    %c0_7 = arith.constant 0 : index
    %8 = vector.load %arg7[%c0_6, %c0_7] : memref<8x128xf32, #tpu.memory_space<vmem>>, vector<8x128xf32>
    tpu.vector_store %arg7[%c0_6, %c0_7], %7 {strides = array<i32>} : memref<8x128xf32, #tpu.memory_space<vmem>>, vector<8x128xf32>,
    %c0_i32_8 = arith.constant 0 : i32
    %9 = arith.cmpi eq, %arg2, %c0_i32_8 : i32
    %10 = arith.extui %9 : i1 to i32
    %c0_i32_9 = arith.constant 0 : i32
    %11 = arith.cmpi ne, %10, %c0_i32_9 : i32
    scf.if %11 {
      %c0_10 = arith.constant 0 : index
      %c0_11 = arith.constant 0 : index
      %12 = vector.load %arg7[%c0_10, %c0_11] : memref<8x128xf32, #tpu.memory_space<vmem>>, vector<8x128xf32>
      %cst_12 = arith.constant 0.000000e+00 : f32
      %13 = vector.broadcast %cst_12 : f32 to vector<8x128xf32>
      %14 = arith.maximumf %12, %13 : vector<8x128xf32>
      %c0_13 = arith.constant 0 : index
      %c0_14 = arith.constant 0 : index
      %15 = vector.load %arg6[%c0_13, %c0_14] : memref<8x128xf32, #tpu.memory_space<vmem>>, vector<8x128xf32>
      tpu.vector_store %arg6[%c0_13, %c0_14], %14 {strides = array<i32>} : memref<8x128xf32, #tpu.memory_space<vmem>>, vector<8x128xf32>,
    } else {
    }
    return
  }
  func.func @transform_0(%arg0: i32, %arg1: i32, %arg2: i32) -> (i32, i32) {
    %c0_i32 = arith.constant 0 : i32
    return %arg0, %arg2 : i32, i32
  }
  func.func @transform_1(%arg0: i32, %arg1: i32, %arg2: i32) -> (i32, i32) {
    %c0_i32 = arith.constant 0 : i32
    return %arg2, %arg1 : i32, i32
  }
  func.func @transform_2(%arg0: i32, %arg1: i32, %arg2: i32) -> (i32, i32) {
    %c0_i32 = arith.constant 0 : i32
    %c0_i32_0 = arith.constant 0 : i32
    return %c0_i32, %arg1 : i32, i32
  }
  func.func @transform_3(%arg0: i32, %arg1: i32, %arg2: i32) -> (i32, i32) {
    %c0_i32 = arith.constant 0 : i32
    return %arg0, %arg1 : i32, i32
  }
}

</mosaic_0001>

<bundles_post_ra>
// kernel: lbad_forward.1
= control target key start
LH: loop header
LB: loop body
LE: loop exit
PB: predicated region body
PF: predicated region fallthrough
CT: control target
= control target key end

     0   :  { %s192_s0 = inlined_call_operand.vmem [shape: f32[8,128], index: 0, kind: input, shape index: {}]   ;;  %s193_s1 = inlined_call_operand.vmem [shape: f32[128,128], index: 1, kind: input, shape index: {}]   ;;  %s194_s2 = inlined_call_operand.vmem [shape: f32[1,128], index: 2, kind: input, shape index: {}]   ;;  %s195_s3 = inlined_call_operand.hbm [shape: f32[8,128], index: 3, kind: output, shape index: {}]  }
   0x1   :  { %v41_v0 = vld [vmem:[%s193_s1 + $0x78] sm:$0xff]  ;;  %v40_v1 = vld [vmem:[%s193_s1 + $0x70] sm:$0xff]  ;;  %v39_v2 = vld [vmem:[%s193_s1 + $0x68] sm:$0xff] }
   0x2   :  { %42 = vmatpush.msra.mxu0 %v41_v0  ;;  %v38_v3 = vld [vmem:[%s193_s1 + $0x60] sm:$0xff]  ;;  %v37_v4 = vld [vmem:[%s193_s1 + $0x58] sm:$0xff] }
   0x4   :  { %43 = vmatpush.msra.mxu0 %v40_v1 }
   0x6   :  { %44 = vmatpush.msra.mxu0 %v39_v2 }
   0x7   :  { %8 = vsyncpa [#allocation4], 0  ;;  %v36_v5 = vld [vmem:[%s193_s1 + $0x50] sm:$0xff]  ;;  %v35_v6 = vld [vmem:[%s193_s1 + $0x48] sm:$0xff]  ;;  %s114_s21 = smov [#allocation3]   ;;  %s77_s25 = sshll.u32 %s195_s3, 4  ;;  %s78_s25 = int_to_ptr.hbm [resolvable:$true] %s77_s25 }
   0x8   :  { %45 = vmatpush.msra.mxu0 %v38_v3  ;;  %v34_v7 = vld [vmem:[%s193_s1 + $0x40] sm:$0xff]  ;;  %v33_v8 = vld [vmem:[%s193_s1 + $0x38] sm:$0xff]  ;;  %v32_v9 = vld [vmem:[%s193_s1 + $0x30] sm:$0xff]  ;;  %s75_s22 = sshll.u32 %s114_s21, 4  ;;  %s76_s22 = int_to_ptr.vmem [resolvable:$true] %s75_s22 }
   0x9   :  { %v31_v10 = vld [vmem:[%s193_s1 + $0x28] sm:$0xff]  ;;  %v30_v11 = vld [vmem:[%s193_s1 + $0x20] sm:$0xff]  ;;  %v29_v12 = vld [vmem:[%s193_s1 + $0x18] sm:$0xff] }
   0xa   :  { %46 = vmatpush.msra.mxu0 %v37_v4  ;;  %v28_v13 = vld [vmem:[%s193_s1 + $0x10] sm:$0xff]  ;;  %v27_v14 = vld [vmem:[%s193_s1 + $0x8] sm:$0xff]  ;;  %v26_v15 = vld [vmem:[%s193_s1] sm:$0xff] }
   0xb   :  { %v25_v16 = vld [vmem:[%s192_s0] sm:$0xff] }
   0xc   :  { %47 = vmatpush.msra.mxu0 %v36_v5  ;;  %v87_v17 = vld [vmem:[%s194_s2] ss:$0 sm:$0xff] }
   0xe   :  { %48 = vmatpush.msra.mxu0 %v35_v6 }
  0x10   :  { %49 = vmatpush.msra.mxu0 %v34_v7 }
  0x12   :  { %50 = vmatpush.msra.mxu0 %v33_v8 }
  0x14   :  { %51 = vmatpush.msra.mxu0 %v32_v9 }
  0x16   :  { %52 = vmatpush.msra.mxu0 %v31_v10 }
  0x18   :  { %53 = vmatpush.msra.mxu0 %v30_v11 }
  0x1a   :  { %54 = vmatpush.msra.mxu0 %v29_v12 }
  0x1c   :  { %55 = vmatpush.msra.mxu0 %v28_v13 }
  0x1e   :  { %56 = vmatpush.msra.mxu0 %v27_v14 }
  0x20   :  { %57 = vmatpush.msra.mxu0 %v26_v15 }
  0x21   :  { %58 = vmatmul.f32.vlgmr.msra.gmra.mxu0 %v25_v16 }
  0x9e   :  { %v59_v18 = vpop.f32.mrf.mxu0 }
  0x9f   :  { %v62_v19 = vadd.f32 %v87_v17, %v59_v18 }
  0xa1   :  { %v68_v20 = vmax.f32 %v62_v19, 0.0 }
  0xa3   :  { %69 = vst [vmem:[#allocation3] sm:$0xff] %v68_v20 }
  0xa4   :  { %80 = dma.vmem_to_hbm [thread:$0]  %s76_s22, 128, %s78_s25, [#allocation4]  }
  0xa5   :  { %112 = dma.done.wait [#allocation4], 128  }
  0xa6   :  { %113 = vsyncadd [#allocation4], 4294967168 }
  0xa7   :  { %85 = vsyncpa [#allocation4], 1 }

</bundles_post_ra>
